<compile_context>
chip_gen: v5e
topology: v5e:2x2
jax: 0.10.0
libtpu: 0.0.40
codegen_flags: <defaults>
</compile_context>

<pallas_src>
import functools

import jax
import jax.numpy as jnp
from jax.experimental import pallas as pl
from jax.experimental.pallas import tpu as pltpu

EPS = 1e-5
OUT_PAD = 128  # lane-dense padded output width for the final linear


def dqn_kernel(x_ref, w1_ref, w2_ref, w3_ref, w4_ref, w5_ref, p_ref, o_ref):
    # p_ref rows: 0:g1 1:be1 2:g2 3:be2 4:g3 5:be3 6:g4 7:be4 8:b5(padded)
    inv_n = 1.0 / x_ref.shape[0]
    p = p_ref[...]  # (9, 256) f32 — single small load, sliced statically below

    def bn_relu(h, g, be):
        # One-pass batch stats: E[x], E[x^2]  (biased variance, training-mode BN).
        s1 = jnp.sum(h, axis=0, keepdims=True)
        s2 = jnp.sum(h * h, axis=0, keepdims=True)
        mean = s1 * inv_n
        var = s2 * inv_n - mean * mean
        # Fold normalize + affine into a single scale/shift over the (B, N) tile.
        scale = g * jax.lax.rsqrt(var + EPS)
        shift = be - mean * scale
        return jnp.maximum(h * scale + shift, 0.0)

    h = x_ref[...].astype(jnp.float32)
    # Layers 1-4: linear (no bias; cancelled by BN) -> BN -> ReLU.
    h = bn_relu(jnp.dot(h, w1_ref[...], preferred_element_type=jnp.float32),
                p[0:1, :], p[1:2, :])
    h = bn_relu(jnp.dot(h, w2_ref[...], preferred_element_type=jnp.float32),
                p[2:3, :], p[3:4, :])
    h = bn_relu(jnp.dot(h, w3_ref[...], preferred_element_type=jnp.float32),
                p[4:5, :128], p[5:6, :128])
    h = bn_relu(jnp.dot(h, w4_ref[...], preferred_element_type=jnp.float32),
                p[6:7, :128], p[7:8, :128])
    # Final linear (padded to 128 lane-dense output columns) + bias.
    o_ref[...] = (jnp.dot(h, w5_ref[...], preferred_element_type=jnp.float32)
                  + p[8:9, :OUT_PAD]).astype(o_ref.dtype)


@functools.partial(jax.jit, static_argnames=())
def dqn_forward(x, params):
    batch = x.shape[0]
    out_dim = params["w5"].shape[1]

    # Pack all (1, N) per-feature vectors into one lane-padded (9, 256) array.
    packed = jnp.zeros((9, 256), jnp.float32)
    packed = packed.at[0, :256].set(params["g1"].reshape(-1))
    packed = packed.at[1, :256].set(params["be1"].reshape(-1))
    packed = packed.at[2, :256].set(params["g2"].reshape(-1))
    packed = packed.at[3, :256].set(params["be2"].reshape(-1))
    packed = packed.at[4, :128].set(params["g3"].reshape(-1))
    packed = packed.at[5, :128].set(params["be3"].reshape(-1))
    packed = packed.at[6, :128].set(params["g4"].reshape(-1))
    packed = packed.at[7, :128].set(params["be4"].reshape(-1))
    packed = packed.at[8, :out_dim].set(params["b5"].reshape(-1))

    # Pad the final weight to a lane-dense 128-wide output (unmasked vst); slice after.
    w5p = jnp.zeros((params["w5"].shape[0], OUT_PAD), jnp.float32)
    w5p = w5p.at[:, :out_dim].set(params["w5"])

    flat_inputs = [x, params["w1"], params["w2"], params["w3"], params["w4"], w5p, packed]
    vmem_spec = pl.BlockSpec(memory_space=pltpu.MemorySpace.VMEM)

    out_padded = pl.pallas_call(
        dqn_kernel,
        out_shape=jax.ShapeDtypeStruct((batch, OUT_PAD), jnp.float32),
        in_specs=[vmem_spec] * len(flat_inputs),
        out_specs=vmem_spec,
    )(*flat_inputs)
    return out_padded[:, :out_dim]


def init_params(key, input_dim, output_dim):
    """Deterministic init mimicking nn.Linear default U(-1/sqrt(fan_in), 1/sqrt(fan_in));
    BatchNorm gamma=1, beta=0. Biases b1..b4 are kept for the reference check (they are
    mathematically cancelled by training-mode BN, so the kernel omits them)."""
    dims = [(input_dim, 256), (256, 256), (256, 128), (128, 128), (128, output_dim)]
    params = {}
    for idx, (din, dout) in enumerate(dims, start=1):
        key, kw, kb = jax.random.split(key, 3)
        bound = 1.0 / jnp.sqrt(jnp.float32(din))
        params[f"w{idx}"] = jax.random.uniform(
            kw, (din, dout), jnp.float32, minval=-bound, maxval=bound)
        params[f"b{idx}"] = jax.random.uniform(
            kb, (1, dout), jnp.float32, minval=-bound, maxval=bound)
        if idx <= 4:  # BatchNorm layers only on the first 4 linears
            params[f"g{idx}"] = jnp.ones((1, dout), jnp.float32)
            params[f"be{idx}"] = jnp.zeros((1, dout), jnp.float32)
    return params


def dqn_reference(x, params):
    """Pure-JAX reference matching the PyTorch forward exactly (with linear biases and
    two-pass training-mode BatchNorm)."""
    def linear(h, w, b):
        return h @ w + b

    def bn_relu(h, g, be):
        mean = jnp.mean(h, axis=0, keepdims=True)
        var = jnp.mean((h - mean) ** 2, axis=0, keepdims=True)
        return jnp.maximum((h - mean) / jnp.sqrt(var + EPS) * g + be, 0.0)

    h = x
    h = bn_relu(linear(h, params["w1"], params["b1"]), params["g1"], params["be1"])
    h = bn_relu(linear(h, params["w2"], params["b2"]), params["g2"], params["be2"])
    h = bn_relu(linear(h, params["w3"], params["b3"]), params["g3"], params["be3"])
    h = bn_relu(linear(h, params["w4"], params["b4"]), params["g4"], params["be4"])
    return linear(h, params["w5"], params["b5"])


if __name__ == "__main__":
    key = jax.random.PRNGKey(0)
    input_dim, output_dim, batch = 32, 8, 8

    key, kx, kp = jax.random.split(key, 3)
    x = jax.random.normal(kx, (batch, input_dim), jnp.float32)
    params = init_params(kp, input_dim, output_dim)

    out = dqn_forward(x, params)
    out = jax.block_until_ready(out)

    ref = dqn_reference(x, params)
    assert out.shape == (batch, output_dim)
    assert jnp.allclose(out, ref, atol=1e-4, rtol=1e-4), "Pallas output mismatch vs JAX reference"

    print("KERNEL_OK")
</pallas_src>

<mosaic_0001>
module attributes {stable_mosaic.version = 11 : i64} {
  func.func @dqn_kernel(%arg0: memref<8x32xf32, #tpu.memory_space<vmem>>, %arg1: memref<32x256xf32, #tpu.memory_space<vmem>>, %arg2: memref<256x256xf32, #tpu.memory_space<vmem>>, %arg3: memref<256x128xf32, #tpu.memory_space<vmem>>, %arg4: memref<128x128xf32, #tpu.memory_space<vmem>>, %arg5: memref<128x128xf32, #tpu.memory_space<vmem>>, %arg6: memref<9x256xf32, #tpu.memory_space<vmem>>, %arg7: memref<8x128xf32, #tpu.memory_space<vmem>>) attributes {dimension_semantics = [], scalar_prefetch = 0 : i64, scratch_operands = 0 : i64, tpu.core_type = #tpu.core_type<tc>} {
    %c0 = arith.constant 0 : index
    %c0_0 = arith.constant 0 : index
    %0 = vector.load %arg6[%c0, %c0_0] : memref<9x256xf32, #tpu.memory_space<vmem>>, vector<9x256xf32>
    %c0_1 = arith.constant 0 : index
    %c0_2 = arith.constant 0 : index
    %1 = vector.load %arg0[%c0_1, %c0_2] : memref<8x32xf32, #tpu.memory_space<vmem>>, vector<8x32xf32>
    %c0_3 = arith.constant 0 : index
    %c0_4 = arith.constant 0 : index
    %2 = vector.load %arg1[%c0_3, %c0_4] : memref<32x256xf32, #tpu.memory_space<vmem>>, vector<32x256xf32>
    %cst = arith.constant dense<0.000000e+00> : vector<8x256xf32>
    %3 = tpu.matmul %1, %2, %cst {dimension_numbers = #tpu.dot_dimension_numbers<[1], [0], [0], [1], [0, 0, 1, 1], [], []>} : vector<8x32xf32>, vector<32x256xf32>, vector<8x256xf32> -> vector<8x256xf32>
    %4 = vector.extract_strided_slice %0 {offsets = [0, 0], sizes = [1, 256], strides = [1, 1]} : vector<9x256xf32> to vector<1x256xf32>
    %5 = vector.extract_strided_slice %0 {offsets = [1, 0], sizes = [1, 256], strides = [1, 1]} : vector<9x256xf32> to vector<1x256xf32>
    %cst_5 = arith.constant dense<0.000000e+00> : vector<256xf32>
    %6 = vector.multi_reduction <add>, %3, %cst_5 [0] : vector<8x256xf32> to vector<256xf32>
    %7 = vector.shape_cast %6 : vector<256xf32> to vector<1x256xf32>
    %8 = arith.mulf %3, %3 : vector<8x256xf32>
    %cst_6 = arith.constant dense<0.000000e+00> : vector<256xf32>
    %9 = vector.multi_reduction <add>, %8, %cst_6 [0] : vector<8x256xf32> to vector<256xf32>
    %10 = vector.shape_cast %9 : vector<256xf32> to vector<1x256xf32>
    %cst_7 = arith.constant 1.250000e-01 : f32
    %11 = vector.broadcast %cst_7 : f32 to vector<1x256xf32>
    %12 = arith.mulf %7, %11 : vector<1x256xf32>
    %cst_8 = arith.constant 1.250000e-01 : f32
    %13 = vector.broadcast %cst_8 : f32 to vector<1x256xf32>
    %14 = arith.mulf %10, %13 : vector<1x256xf32>
    %15 = arith.mulf %12, %12 : vector<1x256xf32>
    %16 = arith.subf %14, %15 : vector<1x256xf32>
    %cst_9 = arith.constant 9.99999974E-6 : f32
    %17 = vector.broadcast %cst_9 : f32 to vector<1x256xf32>
    %18 = arith.addf %16, %17 : vector<1x256xf32>
    %19 = math.rsqrt %18 : vector<1x256xf32>
    %20 = arith.mulf %4, %19 : vector<1x256xf32>
    %21 = arith.mulf %12, %20 : vector<1x256xf32>
    %22 = arith.subf %5, %21 : vector<1x256xf32>
    %23 = vector.broadcast %20 : vector<1x256xf32> to vector<8x256xf32>
    %24 = arith.mulf %3, %23 : vector<8x256xf32>
    %25 = vector.broadcast %22 : vector<1x256xf32> to vector<8x256xf32>
    %26 = arith.addf %24, %25 : vector<8x256xf32>
    %cst_10 = arith.constant 0.000000e+00 : f32
    %27 = vector.broadcast %cst_10 : f32 to vector<8x256xf32>
    %28 = arith.maximumf %26, %27 : vector<8x256xf32>
    %c0_11 = arith.constant 0 : index
    %c0_12 = arith.constant 0 : index
    %29 = vector.load %arg2[%c0_11, %c0_12] : memref<256x256xf32, #tpu.memory_space<vmem>>, vector<256x256xf32>
    %cst_13 = arith.constant dense<0.000000e+00> : vector<8x256xf32>
    %30 = tpu.matmul %28, %29, %cst_13 {dimension_numbers = #tpu.dot_dimension_numbers<[1], [0], [0], [1], [0, 0, 1, 1], [], []>} : vector<8x256xf32>, vector<256x256xf32>, vector<8x256xf32> -> vector<8x256xf32>
    %31 = vector.extract_strided_slice %0 {offsets = [2, 0], sizes = [1, 256], strides = [1, 1]} : vector<9x256xf32> to vector<1x256xf32>
    %32 = vector.extract_strided_slice %0 {offsets = [3, 0], sizes = [1, 256], strides = [1, 1]} : vector<9x256xf32> to vector<1x256xf32>
    %cst_14 = arith.constant dense<0.000000e+00> : vector<256xf32>
    %33 = vector.multi_reduction <add>, %30, %cst_14 [0] : vector<8x256xf32> to vector<256xf32>
    %34 = vector.shape_cast %33 : vector<256xf32> to vector<1x256xf32>
    %35 = arith.mulf %30, %30 : vector<8x256xf32>
    %cst_15 = arith.constant dense<0.000000e+00> : vector<256xf32>
    %36 = vector.multi_reduction <add>, %35, %cst_15 [0] : vector<8x256xf32> to vector<256xf32>
    %37 = vector.shape_cast %36 : vector<256xf32> to vector<1x256xf32>
    %cst_16 = arith.constant 1.250000e-01 : f32
    %38 = vector.broadcast %cst_16 : f32 to vector<1x256xf32>
    %39 = arith.mulf %34, %38 : vector<1x256xf32>
    %cst_17 = arith.constant 1.250000e-01 : f32
    %40 = vector.broadcast %cst_17 : f32 to vector<1x256xf32>
    %41 = arith.mulf %37, %40 : vector<1x256xf32>
    %42 = arith.mulf %39, %39 : vector<1x256xf32>
    %43 = arith.subf %41, %42 : vector<1x256xf32>
    %cst_18 = arith.constant 9.99999974E-6 : f32
    %44 = vector.broadcast %cst_18 : f32 to vector<1x256xf32>
    %45 = arith.addf %43, %44 : vector<1x256xf32>
    %46 = math.rsqrt %45 : vector<1x256xf32>
    %47 = arith.mulf %31, %46 : vector<1x256xf32>
    %48 = arith.mulf %39, %47 : vector<1x256xf32>
    %49 = arith.subf %32, %48 : vector<1x256xf32>
    %50 = vector.broadcast %47 : vector<1x256xf32> to vector<8x256xf32>
    %51 = arith.mulf %30, %50 : vector<8x256xf32>
    %52 = vector.broadcast %49 : vector<1x256xf32> to vector<8x256xf32>
    %53 = arith.addf %51, %52 : vector<8x256xf32>
    %cst_19 = arith.constant 0.000000e+00 : f32
    %54 = vector.broadcast %cst_19 : f32 to vector<8x256xf32>
    %55 = arith.maximumf %53, %54 : vector<8x256xf32>
    %c0_20 = arith.constant 0 : index
    %c0_21 = arith.constant 0 : index
    %56 = vector.load %arg3[%c0_20, %c0_21] : memref<256x128xf32, #tpu.memory_space<vmem>>, vector<256x128xf32>
    %cst_22 = arith.constant dense<0.000000e+00> : vector<8x128xf32>
    %57 = tpu.matmul %55, %56, %cst_22 {dimension_numbers = #tpu.dot_dimension_numbers<[1], [0], [0], [1], [0, 0, 1, 1], [], []>} : vector<8x256xf32>, vector<256x128xf32>, vector<8x128xf32> -> vector<8x128xf32>
    %58 = vector.extract_strided_slice %0 {offsets = [4, 0], sizes = [1, 128], strides = [1, 1]} : vector<9x256xf32> to vector<1x128xf32>
    %59 = vector.extract_strided_slice %0 {offsets = [5, 0], sizes = [1, 128], strides = [1, 1]} : vector<9x256xf32> to vector<1x128xf32>
    %cst_23 = arith.constant dense<0.000000e+00> : vector<128xf32>
    %60 = vector.multi_reduction <add>, %57, %cst_23 [0] : vector<8x128xf32> to vector<128xf32>
    %61 = vector.shape_cast %60 : vector<128xf32> to vector<1x128xf32>
    %62 = arith.mulf %57, %57 : vector<8x128xf32>
    %cst_24 = arith.constant dense<0.000000e+00> : vector<128xf32>
    %63 = vector.multi_reduction <add>, %62, %cst_24 [0] : vector<8x128xf32> to vector<128xf32>
    %64 = vector.shape_cast %63 : vector<128xf32> to vector<1x128xf32>
    %cst_25 = arith.constant 1.250000e-01 : f32
    %65 = vector.broadcast %cst_25 : f32 to vector<1x128xf32>
    %66 = arith.mulf %61, %65 : vector<1x128xf32>
    %cst_26 = arith.constant 1.250000e-01 : f32
    %67 = vector.broadcast %cst_26 : f32 to vector<1x128xf32>
    %68 = arith.mulf %64, %67 : vector<1x128xf32>
    %69 = arith.mulf %66, %66 : vector<1x128xf32>
    %70 = arith.subf %68, %69 : vector<1x128xf32>
    %cst_27 = arith.constant 9.99999974E-6 : f32
    %71 = vector.broadcast %cst_27 : f32 to vector<1x128xf32>
    %72 = arith.addf %70, %71 : vector<1x128xf32>
    %73 = math.rsqrt %72 : vector<1x128xf32>
    %74 = arith.mulf %58, %73 : vector<1x128xf32>
    %75 = arith.mulf %66, %74 : vector<1x128xf32>
    %76 = arith.subf %59, %75 : vector<1x128xf32>
    %77 = vector.broadcast %74 : vector<1x128xf32> to vector<8x128xf32>
    %78 = arith.mulf %57, %77 : vector<8x128xf32>
    %79 = vector.broadcast %76 : vector<1x128xf32> to vector<8x128xf32>
    %80 = arith.addf %78, %79 : vector<8x128xf32>
    %cst_28 = arith.constant 0.000000e+00 : f32
    %81 = vector.broadcast %cst_28 : f32 to vector<8x128xf32>
    %82 = arith.maximumf %80, %81 : vector<8x128xf32>
    %c0_29 = arith.constant 0 : index
    %c0_30 = arith.constant 0 : index
    %83 = vector.load %arg4[%c0_29, %c0_30] : memref<128x128xf32, #tpu.memory_space<vmem>>, vector<128x128xf32>
    %cst_31 = arith.constant dense<0.000000e+00> : vector<8x128xf32>
    %84 = tpu.matmul %82, %83, %cst_31 {dimension_numbers = #tpu.dot_dimension_numbers<[1], [0], [0], [1], [0, 0, 1, 1], [], []>} : vector<8x128xf32>, vector<128x128xf32>, vector<8x128xf32> -> vector<8x128xf32>
    %85 = vector.extract_strided_slice %0 {offsets = [6, 0], sizes = [1, 128], strides = [1, 1]} : vector<9x256xf32> to vector<1x128xf32>
    %86 = vector.extract_strided_slice %0 {offsets = [7, 0], sizes = [1, 128], strides = [1, 1]} : vector<9x256xf32> to vector<1x128xf32>
    %cst_32 = arith.constant dense<0.000000e+00> : vector<128xf32>
    %87 = vector.multi_reduction <add>, %84, %cst_32 [0] : vector<8x128xf32> to vector<128xf32>
    %88 = vector.shape_cast %87 : vector<128xf32> to vector<1x128xf32>
    %89 = arith.mulf %84, %84 : vector<8x128xf32>
    %cst_33 = arith.constant dense<0.000000e+00> : vector<128xf32>
    %90 = vector.multi_reduction <add>, %89, %cst_33 [0] : vector<8x128xf32> to vector<128xf32>
    %91 = vector.shape_cast %90 : vector<128xf32> to vector<1x128xf32>
    %cst_34 = arith.constant 1.250000e-01 : f32
    %92 = vector.broadcast %cst_34 : f32 to vector<1x128xf32>
    %93 = arith.mulf %88, %92 : vector<1x128xf32>
    %cst_35 = arith.constant 1.250000e-01 : f32
    %94 = vector.broadcast %cst_35 : f32 to vector<1x128xf32>
    %95 = arith.mulf %91, %94 : vector<1x128xf32>
    %96 = arith.mulf %93, %93 : vector<1x128xf32>
    %97 = arith.subf %95, %96 : vector<1x128xf32>
    %cst_36 = arith.constant 9.99999974E-6 : f32
    %98 = vector.broadcast %cst_36 : f32 to vector<1x128xf32>
    %99 = arith.addf %97, %98 : vector<1x128xf32>
    %100 = math.rsqrt %99 : vector<1x128xf32>
    %101 = arith.mulf %85, %100 : vector<1x128xf32>
    %102 = arith.mulf %93, %101 : vector<1x128xf32>
    %103 = arith.subf %86, %102 : vector<1x128xf32>
    %104 = vector.broadcast %101 : vector<1x128xf32> to vector<8x128xf32>
    %105 = arith.mulf %84, %104 : vector<8x128xf32>
    %106 = vector.broadcast %103 : vector<1x128xf32> to vector<8x128xf32>
    %107 = arith.addf %105, %106 : vector<8x128xf32>
    %cst_37 = arith.constant 0.000000e+00 : f32
    %108 = vector.broadcast %cst_37 : f32 to vector<8x128xf32>
    %109 = arith.maximumf %107, %108 : vector<8x128xf32>
    %c0_38 = arith.constant 0 : index
    %c0_39 = arith.constant 0 : index
    %110 = vector.load %arg5[%c0_38, %c0_39] : memref<128x128xf32, #tpu.memory_space<vmem>>, vector<128x128xf32>
    %cst_40 = arith.constant dense<0.000000e+00> : vector<8x128xf32>
    %111 = tpu.matmul %109, %110, %cst_40 {dimension_numbers = #tpu.dot_dimension_numbers<[1], [0], [0], [1], [0, 0, 1, 1], [], []>} : vector<8x128xf32>, vector<128x128xf32>, vector<8x128xf32> -> vector<8x128xf32>
    %112 = vector.extract_strided_slice %0 {offsets = [8, 0], sizes = [1, 128], strides = [1, 1]} : vector<9x256xf32> to vector<1x128xf32>
    %113 = vector.broadcast %112 : vector<1x128xf32> to vector<8x128xf32>
    %114 = arith.addf %111, %113 : vector<8x128xf32>
    %c0_41 = arith.constant 0 : index
    %c0_42 = arith.constant 0 : index
    %115 = vector.load %arg7[%c0_41, %c0_42] : memref<8x128xf32, #tpu.memory_space<vmem>>, vector<8x128xf32>
    tpu.vector_store %arg7[%c0_41, %c0_42], %114 {strides = array<i32>} : memref<8x128xf32, #tpu.memory_space<vmem>>, vector<8x128xf32>,
    return
  }
}

</mosaic_0001>

<bundles_post_ra>
// kernel: dqn_forward.1
= control target key start
LH: loop header
LB: loop body
LE: loop exit
PB: predicated region body
PF: predicated region fallthrough
CT: control target
= control target key end

     0   :  { %12 = vsyncpa [#allocation3], 0  ;;  %s1157_s0 = inlined_call_operand.vmem [shape: f32[8,32], index: 0, kind: input, shape index: {}]   ;;  %s1158_s1 = inlined_call_operand.hbm [shape: f32[32,256], index: 1, kind: input, shape index: {}]   ;;  %s1159_s2 = inlined_call_operand.vmem [shape: f32[256,256], index: 2, kind: input, shape index: {}]   ;;  %s1160_s3 = inlined_call_operand.hbm [shape: f32[256,128], index: 3, kind: input, shape index: {}]   ;;  %s1161_s4 = inlined_call_operand.vmem [shape: f32[128,128], index: 4, kind: input, shape index: {}]   ;;  %s1162_s5 = inlined_call_operand.vmem [shape: f32[128,128], index: 5, kind: input, shape index: {}]   ;;  %s1163_s6 = inlined_call_operand.vmem [shape: f32[9,256], index: 6, kind: input, shape index: {}]   ;;  %s1164_s7 = inlined_call_operand.hbm [shape: f32[8,128], index: 7, kind: output, shape index: {}]  }
   0x1   :  { %13 = vsyncpa [#allocation6], 0 }
   0x2   :  { %14 = vsyncpa [#allocation4], 0  ;;  %s21_s26 = sshll.u32 %s1158_s1, 4  ;;  %s757_s27 = smov [#allocation2]   ;;  %s22_s26 = int_to_ptr.hbm [resolvable:$true] %s21_s26 }
   0x3   :  { %s23_s28 = sshll.u32 %s757_s27, 4  ;;  %s36_s8 = sshll.u32 %s1160_s3, 4  ;;  %s24_s28 = int_to_ptr.vmem [resolvable:$true] %s23_s28  ;;  %s37_s8 = int_to_ptr.hbm [resolvable:$true] %s36_s8 }
   0x4   :  { %s758_s9 = smov 256   ;;  %s759_s10 = smov 16  }
   0x5   :  { %29 = dma.hbm_to_vmem [thread:$0]  %s22_s26, 1024, %s24_s28, [#allocation3], %s758_s9, %s758_s9, %s759_s10  }
   0x6   :  { %s760_s11 = smov [#allocation5]   ;;  %s761_s13 = smov 128  }
   0x7   :  { %s38_s12 = sshll.u32 %s760_s11, 4  ;;  %s762_s14 = smov 8   ;;  %s39_s12 = int_to_ptr.vmem [resolvable:$true] %s38_s12 }
   0x8   :  { %44 = dma.hbm_to_vmem [thread:$0]  %s37_s8, 4096, %s39_s12, [#allocation6], %s761_s13, %s761_s13, %s762_s14  }
   0x9   :  { %751 = dma.done.wait [#allocation3], 1024  }
   0xa   :  { %752 = vsyncadd [#allocation3], 4294966272 }
   0xb   :  { %753 = dma.done.wait [#allocation6], 4096  }
   0xc   :  { %754 = vsyncadd [#allocation6], 4294963200  ;;  %v69_v0 = vld [vmem:[#allocation2 + $0x30] sm:$0xff]  ;;  %v70_v1 = vld [vmem:[#allocation2 + $0x38] sm:$0xff]  ;;  %vm71_vm0 = vcmask 261120   ;;  %s763_s24 = smov [#allocation7]  }
   0xd   :  { %v67_v2 = vld [vmem:[#allocation2 + $0x20] sm:$0xff]  ;;  %87 = vmatpush.msra.mxu0 %v69_v0  ;;  %107 = vmatpush.msra.mxu1 %v70_v1  ;;  %v68_v3 = vld [vmem:[#allocation2 + $0x28] sm:$0xff]  ;;  %v65_v4 = vld [vmem:[#allocation2 + $0x10] sm:$0xff]  ;;  %s644_s25 = sshll.u32 %s763_s24, 4  ;;  %s646_s28 = sshll.u32 %s1164_s7, 4  ;;  %s645_s25 = int_to_ptr.vmem [resolvable:$true] %s644_s25  ;;  %s647_s28 = int_to_ptr.hbm [resolvable:$true] %s646_s28 }
   0xe   :  { %v66_v5 = vld [vmem:[#allocation2 + $0x18] sm:$0xff]  ;;  %v63_v6 = vld [vmem:[#allocation2] sm:$0xff]  ;;  %v64_v7 = vld [vmem:[#allocation2 + $0x8] sm:$0xff] }
   0xf   :  { %88 = vmatpush.msra.mxu0 %v67_v2  ;;  %108 = vmatpush.msra.mxu1 %v68_v3  ;;  %v62_v8 = vld [vmem:[%s1157_s0] sm:$0xff]  ;;  %v223_v9 = vld [vmem:[%s1159_s2 + $0xf0] sm:$0xff]  ;;  %v224_v11 = vld [vmem:[%s1159_s2 + $0xf8] sm:$0xff] }
  0x10   :  { %v255_v10 = vld [vmem:[%s1159_s2 + $0x1f0] sm:$0xff]  ;;  %257 = vmatpush.msra.mxu2 %v223_v9  ;;  %v256_v12 = vld [vmem:[%s1159_s2 + $0x1f8] sm:$0xff]  ;;  %v221_v13 = vld [vmem:[%s1159_s2 + $0xe0] sm:$0xff] }
  0x11   :  { %89 = vmatpush.msra.mxu0 %v65_v4  ;;  %109 = vmatpush.msra.mxu1 %v66_v5  ;;  %v253_v14 = vld [vmem:[%s1159_s2 + $0x1e0] sm:$0xff]  ;;  %v222_v15 = vld [vmem:[%s1159_s2 + $0xe8] sm:$0xff]  ;;  %v219_v17 = vld [vmem:[%s1159_s2 + $0xd0] sm:$0xff] }
  0x12   :  { %277 = vmatpush.msra.mxu3 %v255_v10  ;;  %v254_v16 = vld [vmem:[%s1159_s2 + $0x1e8] sm:$0xff]  ;;  %258 = vmatpush.msra.mxu2 %v221_v13  ;;  %v251_v18 = vld [vmem:[%s1159_s2 + $0x1d0] sm:$0xff]  ;;  %v220_v19 = vld [vmem:[%s1159_s2 + $0xd8] sm:$0xff] }
  0x13   :  { %90 = vmatpush.msra.mxu0 %v63_v6  ;;  %110 = vmatpush.msra.mxu1 %v64_v7  ;;  %v252_v20 = vld [vmem:[%s1159_s2 + $0x1d8] sm:$0xff]  ;;  %v217_v21 = vld [vmem:[%s1159_s2 + $0xc0] sm:$0xff]  ;;  %v218_v23 = vld [vmem:[%s1159_s2 + $0xc8] sm:$0xff] }
  0x14   :  { %657 = vmatmul.msk.f32.vlgmr.msra.gmra.mxu0 %vm71_vm0, %v62_v8  ;;  %658 = vmatmul.msk.f32.vlgmr.msra.gmra.mxu1 %vm71_vm0, %v62_v8  ;;  %v249_v22 = vld [vmem:[%s1159_s2 + $0x1c0] sm:$0xff]  ;;  %v250_v24 = vld [vmem:[%s1159_s2 + $0x1c8] sm:$0xff]  ;;  %v215_v25 = vld [vmem:[%s1159_s2 + $0xb0] sm:$0xff] }
  0x15   :  { %297 = vmatpush.msrb.mxu0 %v224_v11  ;;  %317 = vmatpush.msrb.mxu1 %v256_v12  ;;  %v247_v26 = vld [vmem:[%s1159_s2 + $0x1b0] sm:$0xff]  ;;  %v216_v27 = vld [vmem:[%s1159_s2 + $0xb8] sm:$0xff]  ;;  %v213_v29 = vld [vmem:[%s1159_s2 + $0xa0] sm:$0xff] }
  0x16   :  { %278 = vmatpush.msra.mxu3 %v253_v14  ;;  %259 = vmatpush.msra.mxu2 %v219_v17  ;;  %v248_v28 = vld [vmem:[%s1159_s2 + $0x1b8] sm:$0xff]  ;;  %v245_v30 = vld [vmem:[%s1159_s2 + $0x1a0] sm:$0xff]  ;;  %v214_v31 = vld [vmem:[%s1159_s2 + $0xa8] sm:$0xff] }
  0x17   :  { %298 = vmatpush.msrb.mxu0 %v222_v15  ;;  %318 = vmatpush.msrb.mxu1 %v254_v16  ;;  %v246_v32 = vld [vmem:[%s1159_s2 + $0x1a8] sm:$0xff]  ;;  %v211_v33 = vld [vmem:[%s1159_s2 + $0x90] sm:$0xff]  ;;  %v212_v35 = vld [vmem:[%s1159_s2 + $0x98] sm:$0xff] }
  0x18   :  { %279 = vmatpush.msra.mxu3 %v251_v18  ;;  %260 = vmatpush.msra.mxu2 %v217_v21  ;;  %v243_v34 = vld [vmem:[%s1159_s2 + $0x190] sm:$0xff]  ;;  %v244_v36 = vld [vmem:[%s1159_s2 + $0x198] sm:$0xff]  ;;  %v209_v37 = vld [vmem:[%s1159_s2 + $0x80] sm:$0xff] }
  0x19   :  { %299 = vmatpush.msrb.mxu0 %v220_v19  ;;  %319 = vmatpush.msrb.mxu1 %v252_v20  ;;  %v241_v38 = vld [vmem:[%s1159_s2 + $0x180] sm:$0xff]  ;;  %v210_v39 = vld [vmem:[%s1159_s2 + $0x88] sm:$0xff]  ;;  %v207_v41 = vld [vmem:[%s1159_s2 + $0x70] sm:$0xff] }
  0x1a   :  { %280 = vmatpush.msra.mxu3 %v249_v22  ;;  %261 = vmatpush.msra.mxu2 %v215_v25  ;;  %v242_v40 = vld [vmem:[%s1159_s2 + $0x188] sm:$0xff]  ;;  %v239_v42 = vld [vmem:[%s1159_s2 + $0x170] sm:$0xff]  ;;  %v208_v43 = vld [vmem:[%s1159_s2 + $0x78] sm:$0xff] }
  0x1b   :  { %300 = vmatpush.msrb.mxu0 %v218_v23  ;;  %320 = vmatpush.msrb.mxu1 %v250_v24  ;;  %v240_v44 = vld [vmem:[%s1159_s2 + $0x178] sm:$0xff]  ;;  %v205_v45 = vld [vmem:[%s1159_s2 + $0x60] sm:$0xff]  ;;  %v206_v49 = vld [vmem:[%s1159_s2 + $0x68] sm:$0xff] }
  0x1c   :  { %281 = vmatpush.msra.mxu3 %v247_v26  ;;  %262 = vmatpush.msra.mxu2 %v213_v29  ;;  %v237_v46 = vld [vmem:[%s1159_s2 + $0x160] sm:$0xff]  ;;  %v238_v50 = vld [vmem:[%s1159_s2 + $0x168] sm:$0xff]  ;;  %v203_v55 = vld [vmem:[%s1159_s2 + $0x50] sm:$0xff] }
  0x1d   :  { %301 = vmatpush.msrb.mxu0 %v216_v27  ;;  %321 = vmatpush.msrb.mxu1 %v248_v28  ;;  %v235_v56 = vld [vmem:[%s1159_s2 + $0x150] sm:$0xff]  ;;  %v204_v57 = vld [vmem:[%s1159_s2 + $0x58] sm:$0xff]  ;;  %v201_v63 = vld [vmem:[%s1159_s2 + $0x40] sm:$0xff] }
  0x1e   :  { %282 = vmatpush.msra.mxu3 %v245_v30  ;;  %263 = vmatpush.msra.mxu2 %v211_v33  ;;  %v236_v58 = vld [vmem:[%s1159_s2 + $0x158] sm:$0xff]  ;;  %v233_v0 = vld [vmem:[%s1159_s2 + $0x140] sm:$0xff]  ;;  %v202_v1 = vld [vmem:[%s1159_s2 + $0x48] sm:$0xff] }
  0x1f   :  { %302 = vmatpush.msrb.mxu0 %v214_v31  ;;  %322 = vmatpush.msrb.mxu1 %v246_v32  ;;  %v234_v2 = vld [vmem:[%s1159_s2 + $0x148] sm:$0xff]  ;;  %v199_v7 = vld [vmem:[%s1159_s2 + $0x30] sm:$0xff]  ;;  %v200_v9 = vld [vmem:[%s1159_s2 + $0x38] sm:$0xff] }
  0x20   :  { %283 = vmatpush.msra.mxu3 %v243_v34  ;;  %264 = vmatpush.msra.mxu2 %v209_v37  ;;  %v231_v8 = vld [vmem:[%s1159_s2 + $0x130] sm:$0xff]  ;;  %v232_v10 = vld [vmem:[%s1159_s2 + $0x138] sm:$0xff]  ;;  %v197_v15 = vld [vmem:[%s1159_s2 + $0x20] sm:$0xff] }
  0x21   :  { %303 = vmatpush.msrb.mxu0 %v212_v35  ;;  %323 = vmatpush.msrb.mxu1 %v244_v36  ;;  %v229_v16 = vld [vmem:[%s1159_s2 + $0x120] sm:$0xff]  ;;  %v198_v17 = vld [vmem:[%s1159_s2 + $0x28] sm:$0xff]  ;;  %v195_v23 = vld [vmem:[%s1159_s2 + $0x10] sm:$0xff] }
  0x22   :  { %284 = vmatpush.msra.mxu3 %v241_v38  ;;  %265 = vmatpush.msra.mxu2 %v207_v41  ;;  %v230_v18 = vld [vmem:[%s1159_s2 + $0x128] sm:$0xff]  ;;  %v227_v24 = vld [vmem:[%s1159_s2 + $0x110] sm:$0xff]  ;;  %v196_v25 = vld [vmem:[%s1159_s2 + $0x18] sm:$0xff] }
  0x23   :  { %304 = vmatpush.msrb.mxu0 %v210_v39  ;;  %324 = vmatpush.msrb.mxu1 %v242_v40  ;;  %v228_v26 = vld [vmem:[%s1159_s2 + $0x118] sm:$0xff]  ;;  %v193_v29 = vld [vmem:[%s1159_s2] sm:$0xff]  ;;  %v194_v33 = vld [vmem:[%s1159_s2 + $0x8] sm:$0xff] }
  0x24   :  { %285 = vmatpush.msra.mxu3 %v239_v42  ;;  %266 = vmatpush.msra.mxu2 %v205_v45  ;;  %v225_v30 = vld [vmem:[%s1159_s2 + $0x100] sm:$0xff]  ;;  %v226_v34 = vld [vmem:[%s1159_s2 + $0x108] sm:$0xff] }
  0x25   :  { %305 = vmatpush.msrb.mxu0 %v208_v43  ;;  %325 = vmatpush.msrb.mxu1 %v240_v44 }
  0x26   :  { %286 = vmatpush.msra.mxu3 %v237_v46  ;;  %267 = vmatpush.msra.mxu2 %v203_v55 }
  0x27   :  { %306 = vmatpush.msrb.mxu0 %v206_v49  ;;  %326 = vmatpush.msrb.mxu1 %v238_v50 }
  0x28   :  { %287 = vmatpush.msra.mxu3 %v235_v56  ;;  %268 = vmatpush.msra.mxu2 %v201_v63 }
  0x29   :  { %307 = vmatpush.msrb.mxu0 %v204_v57  ;;  %327 = vmatpush.msrb.mxu1 %v236_v58 }
  0x2a   :  { %288 = vmatpush.msra.mxu3 %v233_v0  ;;  %269 = vmatpush.msra.mxu2 %v199_v7 }
  0x2b   :  { %308 = vmatpush.msrb.mxu0 %v202_v1  ;;  %328 = vmatpush.msrb.mxu1 %v234_v2 }
  0x2c   :  { %289 = vmatpush.msra.mxu3 %v231_v8  ;;  %270 = vmatpush.msra.mxu2 %v197_v15 }
  0x2d   :  { %309 = vmatpush.msrb.mxu0 %v200_v9  ;;  %329 = vmatpush.msrb.mxu1 %v232_v10 }
  0x2e   :  { %290 = vmatpush.msra.mxu3 %v229_v16  ;;  %271 = vmatpush.msra.mxu2 %v195_v23  ;;  %v444_v23 = vld [vmem:[#allocation5 + $0xe8] sm:$0xff] }
  0x2f   :  { %310 = vmatpush.msrb.mxu0 %v198_v17  ;;  %330 = vmatpush.msrb.mxu1 %v230_v18 }
  0x30   :  { %291 = vmatpush.msra.mxu3 %v227_v24  ;;  %272 = vmatpush.msra.mxu2 %v193_v29  ;;  %v443_v24 = vld [vmem:[#allocation5 + $0xe0] sm:$0xff] }
  0x31   :  { %311 = vmatpush.msrb.mxu0 %v196_v25  ;;  %331 = vmatpush.msrb.mxu1 %v228_v26  ;;  %v442_v25 = vld [vmem:[#allocation5 + $0xd8] sm:$0xff] }
  0x32   :  { %292 = vmatpush.msra.mxu3 %v225_v30  ;;  %v426_v26 = vld [vmem:[#allocation5 + $0x58] sm:$0xff]  ;;  %v425_v30 = vld [vmem:[#allocation5 + $0x50] sm:$0xff] }
  0x33   :  { %312 = vmatpush.msrb.mxu0 %v194_v33  ;;  %332 = vmatpush.msrb.mxu1 %v226_v34  ;;  %v424_v33 = vld [vmem:[#allocation5 + $0x48] sm:$0xff] }
  0x91   :  { %v927_v47 = vpop.f32.mrf.mxu0  ;;  %v929_v48 = vpop.f32.mrf.mxu1 }
  0x92   :  { %v115_v51 = vrot.slane %v927_v47, 4  ;;  %v127_v52 = vmul.f32 %v927_v47, %v927_v47  ;;  %v121_v53 = vrot.slane %v929_v48, 4  ;;  %v128_v54 = vmul.f32 %v929_v48, %v929_v48 }
  0x94   :  { %v116_v59 = vadd.f32 %v115_v51, %v927_v47  ;;  %v129_v60 = vrot.slane %v127_v52, 4  ;;  %v122_v61 = vadd.f32 %v121_v53, %v929_v48  ;;  %v135_v62 = vrot.slane %v128_v54, 4 }
  0x96   :  { %v117_v3 = vrot.slane %v116_v59, 2  ;;  %v130_v4 = vadd.f32 %v129_v60, %v127_v52  ;;  %v123_v5 = vrot.slane %v122_v61, 2  ;;  %v136_v6 = vadd.f32 %v135_v62, %v128_v54 }
  0x98   :  { %v118_v11 = vadd.f32 %v117_v3, %v116_v59  ;;  %v131_v12 = vrot.slane %v130_v4, 2  ;;  %v124_v13 = vadd.f32 %v123_v5, %v122_v61  ;;  %v137_v14 = vrot.slane %v136_v6, 2  ;;  %v1020_v59 = vld [vmem:[%s1163_s6] sm:$0xff]  ;;  %v1025_v61 = vld [vmem:[%s1163_s6 + $0x8] sm:$0xff] }
  0x9a   :  { %v119_v19 = vrot.slane %v118_v11, 1  ;;  %v132_v20 = vadd.f32 %v131_v12, %v130_v4  ;;  %v125_v21 = vrot.slane %v124_v13, 1  ;;  %v138_v22 = vadd.f32 %v137_v14, %v136_v6 }
  0x9c   :  { %v133_v27 = vrot.slane %v132_v20, 1  ;;  %v139_v28 = vrot.slane %v138_v22, 1  ;;  %v120_v31 = vadd.f32 %v119_v19, %v118_v11  ;;  %v126_v32 = vadd.f32 %v125_v21, %v124_v13  ;;  %v446_v19 = vld [vmem:[#allocation5 + $0xf8] sm:$0xff] }
  0x9d   :  { %467 = vmatpush.msrb.mxu3 %v446_v19  ;;  %v430_v21 = vld [vmem:[#allocation5 + $0x78] sm:$0xff] }
  0x9e   :  { %v134_v35 = vadd.f32 %v133_v27, %v132_v20  ;;  %v140_v36 = vadd.f32 %v139_v28, %v138_v22  ;;  %v141_v37 = vmul.f32 0.125, %v120_v31  ;;  %v142_v38 = vmul.f32 0.125, %v126_v32  ;;  %v445_v20 = vld [vmem:[#allocation5 + $0xf0] sm:$0xff]  ;;  %447 = vmatpush.msrb.mxu2 %v430_v21  ;;  %v440_v32 = vld [vmem:[#allocation5 + $0xc8] sm:$0xff] }
  0x9f   :  { %v429_v22 = vld [vmem:[#allocation5 + $0x70] sm:$0xff]  ;;  %468 = vmatpush.msrb.mxu3 %v445_v20 }
  0xa0   :  { %v143_v39 = vmul.f32 0.125, %v134_v35  ;;  %v144_v40 = vmul.f32 0.125, %v140_v36  ;;  %v145_v41 = vmul.f32 %v141_v37, %v141_v37  ;;  %v146_v42 = vmul.f32 %v142_v38, %v142_v38  ;;  %448 = vmatpush.msrb.mxu2 %v429_v22  ;;  %v441_v28 = vld [vmem:[#allocation5 + $0xd0] sm:$0xff]  ;;  %v439_v36 = vld [vmem:[#allocation5 + $0xc0] sm:$0xff] }
  0xa1   :  { %469 = vmatpush.msrb.mxu3 %v444_v23 }
  0xa2   :  { %v147_v43 = vsub.f32 %v143_v39, %v145_v41  ;;  %v148_v44 = vsub.f32 %v144_v40, %v146_v42  ;;  %v438_v41 = vld [vmem:[#allocation5 + $0xb8] sm:$0xff] }
  0xa3   :  { %470 = vmatpush.msrb.mxu3 %v443_v24  ;;  %v417_v24 = vld [vmem:[#allocation5 + $0x10] sm:$0xff] }
  0xa4   :  { %v149_v45 = vadd.f32 1e-05, %v147_v43  ;;  %v150_v46 = vadd.f32 1e-05, %v148_v44  ;;  %v422_v43 = vld [vmem:[#allocation5 + $0x38] sm:$0xff] }
  0xa5   :  { %471 = vmatpush.msrb.mxu3 %v442_v25 }
  0xa6   :  { %667 = vrsqrt.f32 %v149_v45  ;;  %vm157_vm3 = vweird.f32 %v149_v45  ;;  %vm167_vm5 = vweird.f32 %v150_v46 }
  0xa7   :  { %669 = vrsqrt.f32 %v150_v46  ;;  %472 = vmatpush.msrb.mxu3 %v441_v28 }
  0xa9   :  { %473 = vmatpush.msrb.mxu3 %v440_v32 }
  0xab   :  { %474 = vmatpush.msrb.mxu3 %v439_v36 }
  0xac   :  { %v668_v49 = vpop.eup %667 }
  0xad   :  { %v670_v50 = vpop.eup %669  ;;  %v152_v51 = vmul.f32 %v668_v49, %v149_v45  ;;  %vm158_vm1 = vweird.f32 %v668_v49  ;;  %475 = vmatpush.msrb.mxu3 %v438_v41 }
  0xae   :  { %v162_v52 = vmul.f32 %v670_v50, %v150_v46  ;;  %vm168_vm2 = vweird.f32 %v670_v50  ;;  %vm159_vm4 = vmor %vm157_vm3, %vm158_vm1 }
  0xaf   :  { %v153_v53 = vmul.f32 %v668_v49, %v152_v51  ;;  %vm169_vm6 = vmor %vm167_vm5, %vm168_vm2 }
  0xb0   :  { %v163_v54 = vmul.f32 %v670_v50, %v162_v52 }
  0xb1   :  { %v154_v55 = vmul.f32 0.5, %v153_v53 }
  0xb2   :  { %v164_v56 = vmul.f32 0.5, %v163_v54 }
  0xb3   :  { %v155_v57 = vsub.f32 1.5, %v154_v55  ;;  %v436_v55 = vld [vmem:[#allocation5 + $0xa8] sm:$0xff] }
  0xb4   :  { %v165_v58 = vsub.f32 1.5, %v164_v56  ;;  %v420_v56 = vld [vmem:[#allocation5 + $0x28] sm:$0xff] }
  0xb5   :  { %v156_v60 = vmul.f32 %v668_v49, %v155_v57 }
  0xb6   :  { %v166_v62 = vmul.f32 %v670_v50, %v165_v58 }
  0xb7   :  { %v160_v63 = vsel %vm159_vm4, %v668_v49, %v156_v60  ;;  %v437_v49 = vld [vmem:[#allocation5 + $0xb0] sm:$0xff] }
  0xb8   :  { %v171_v0 = vmul.f32 %v160_v63, %v1020_v59  ;;  %v170_v1 = vsel %vm169_vm6, %v670_v50, %v166_v62  ;;  %v421_v50 = vld [vmem:[#allocation5 + $0x30] sm:$0xff]  ;;  %476 = vmatpush.msrb.mxu3 %v437_v49  ;;  %v435_v63 = vld [vmem:[#allocation5 + $0xa0] sm:$0xff] }
  0xb9   :  { %v172_v2 = vmul.f32 %v170_v1, %v1025_v61 }
  0xba   :  { %v173_v3 = vmul.f32 %v171_v0, %v141_v37  ;;  %v183_v6 = vperm.slane %v171_v0, 0  ;;  %v423_v37 = vld [vmem:[#allocation5 + $0x40] sm:$0xff]  ;;  %477 = vmatpush.msrb.mxu3 %v436_v55 }
  0xbb   :  { %v174_v4 = vmul.f32 %v172_v2, %v142_v38  ;;  %v184_v8 = vperm.slane %v172_v2, 0  ;;  %v419_v0 = vld [vmem:[#allocation5 + $0x20] sm:$0xff] }
  0xbc   :  { %v177_v5 = vrot.slane %v173_v3, 7  ;;  %v185_v11 = vmul.f32 %v183_v6, %v927_v47  ;;  %v428_v47 = vld [vmem:[#allocation5 + $0x68] sm:$0xff]  ;;  %478 = vmatpush.msrb.mxu3 %v435_v63  ;;  %v418_v6 = vld [vmem:[#allocation5 + $0x18] sm:$0xff] }
  0xbd   :  { %v178_v7 = vrot.slane %v174_v4, 7  ;;  %v186_v13 = vmul.f32 %v184_v8, %v929_v48  ;;  %v427_v48 = vld [vmem:[#allocation5 + $0x60] sm:$0xff]  ;;  %449 = vmatpush.msrb.mxu2 %v428_v47  ;;  %v434_v4 = vld [vmem:[#allocation5 + $0x98] sm:$0xff] }
  0xbe   :  { %v181_v9 = vsub.f32 %v1020_v59, %v177_v5  ;;  %479 = vmatpush.msrb.mxu3 %v434_v4  ;;  %v537_v4 = vld [vmem:[%s1161_s4 + $0x58] sm:$0xff] }
  0xbf   :  { %v182_v10 = vsub.f32 %v1025_v61, %v178_v7  ;;  %450 = vmatpush.msrb.mxu2 %v427_v48  ;;  %v416_v48 = vld [vmem:[#allocation5 + $0x8] sm:$0xff] }
  0xc0   :  { %v187_v12 = vperm.slane %v181_v9, 1 }
  0xc1   :  { %v188_v14 = vperm.slane %v182_v10, 1  ;;  %451 = vmatpush.msrb.mxu2 %v426_v26  ;;  %v433_v10 = vld [vmem:[#allocation5 + $0x90] sm:$0xff]  ;;  %v415_v26 = vld [vmem:[#allocation5] sm:$0xff] }
  0xc2   :  { %v189_v15 = vadd.f32 %v187_v12, %v185_v11  ;;  %480 = vmatpush.msrb.mxu3 %v433_v10 }
  0xc3   :  { %v190_v16 = vadd.f32 %v188_v14, %v186_v13  ;;  %452 = vmatpush.msrb.mxu2 %v425_v30 }
  0xc4   :  { %v191_v17 = vmax.f32 %v189_v15, 0.0  ;;  %v432_v15 = vld [vmem:[#allocation5 + $0x88] sm:$0xff] }
  0xc5   :  { %v192_v18 = vmax.f32 %v190_v16, 0.0  ;;  %453 = vmatpush.msrb.mxu2 %v424_v33  ;;  %481 = vmatpush.msrb.mxu3 %v432_v15 }
  0xc6   :  { %273 = vmatmul.f32.vlgmr.msra.gmra.mxu2 %v191_v17  ;;  %313 = vmatmul.f32.vlgmr.msrb.gmra.mxu0 %v191_v17 }
  0xc7   :  { %293 = vmatmul.f32.vlgmr.msra.gmra.mxu3 %v192_v18  ;;  %333 = vmatmul.f32.vlgmr.msrb.gmra.mxu1 %v192_v18  ;;  %v431_v18 = vld [vmem:[#allocation5 + $0x80] sm:$0xff] }
  0xc8   :  { %454 = vmatpush.msrb.mxu2 %v423_v37  ;;  %482 = vmatpush.msrb.mxu3 %v431_v18 }
  0xca   :  { %455 = vmatpush.msrb.mxu2 %v422_v43 }
  0xcc   :  { %456 = vmatpush.msrb.mxu2 %v421_v50 }
  0xce   :  { %457 = vmatpush.msrb.mxu2 %v420_v56 }
  0xd0   :  { %458 = vmatpush.msrb.mxu2 %v419_v0 }
  0xd2   :  { %459 = vmatpush.msrb.mxu2 %v418_v6 }
  0xd4   :  { %460 = vmatpush.msrb.mxu2 %v417_v24 }
  0xd6   :  { %461 = vmatpush.msrb.mxu2 %v416_v48  ;;  %v530_v48 = vld [vmem:[%s1161_s4 + $0x20] sm:$0xff] }
  0xd8   :  { %462 = vmatpush.msrb.mxu2 %v415_v26 }
 0x143   :  { %v314_v27 = vpop.f32.mrf.mxu0 }
 0x144   :  { %v334_v29 = vpop.f32.mrf.mxu1 }
 0x145   :  { %v1033_v31 = vadd.f32 %v334_v29, %v314_v27 }
 0x147   :  { %v343_v34 = vrot.slane %v1033_v31, 4  ;;  %v350_v35 = vmul.f32 %v1033_v31, %v1033_v31 }
 0x149   :  { %v344_v38 = vadd.f32 %v343_v34, %v1033_v31  ;;  %v357_v39 = vrot.slane %v350_v35, 4  ;;  %v274_v40 = vpop.f32.mrf.mxu2 }
 0x14a   :  { %v294_v42 = vpop.f32.mrf.mxu3 }
 0x14b   :  { %v345_v44 = vrot.slane %v344_v38, 2  ;;  %v358_v45 = vadd.f32 %v357_v39, %v350_v35  ;;  %v1039_v46 = vadd.f32 %v294_v42, %v274_v40 }
 0x14d   :  { %v346_v51 = vadd.f32 %v345_v44, %v344_v38  ;;  %v359_v52 = vrot.slane %v358_v45, 2  ;;  %v337_v53 = vrot.slane %v1039_v46, 4  ;;  %v349_v54 = vmul.f32 %v1039_v46, %v1039_v46 }
 0x14f   :  { %v347_v57 = vrot.slane %v346_v51, 1  ;;  %v360_v58 = vadd.f32 %v359_v52, %v358_v45  ;;  %v338_v60 = vadd.f32 %v337_v53, %v1039_v46  ;;  %v351_v62 = vrot.slane %v349_v54, 4 }
 0x151   :  { %v361_v1 = vrot.slane %v360_v58, 1  ;;  %v339_v2 = vrot.slane %v338_v60, 2  ;;  %v352_v3 = vadd.f32 %v351_v62, %v349_v54  ;;  %v348_v5 = vadd.f32 %v347_v57, %v346_v51 }
 0x153   :  { %v362_v7 = vadd.f32 %v361_v1, %v360_v58  ;;  %v340_v8 = vadd.f32 %v339_v2, %v338_v60  ;;  %v353_v9 = vrot.slane %v352_v3, 2  ;;  %v364_v11 = vmul.f32 0.125, %v348_v5 }
 0x155   :  { %v366_v12 = vmul.f32 0.125, %v362_v7  ;;  %v341_v13 = vrot.slane %v340_v8, 1  ;;  %v354_v14 = vadd.f32 %v353_v9, %v352_v3  ;;  %v368_v16 = vmul.f32 %v364_v11, %v364_v11  ;;  %v539_v3 = vld [vmem:[%s1161_s4 + $0x68] sm:$0xff] }
 0x157   :  { %v355_v17 = vrot.slane %v354_v14, 1  ;;  %v370_v19 = vsub.f32 %v366_v12, %v368_v16  ;;  %v342_v20 = vadd.f32 %v341_v13, %v340_v8  ;;  %v536_v8 = vld [vmem:[%s1161_s4 + $0x50] sm:$0xff] }
 0x159   :  { %v356_v21 = vadd.f32 %v355_v17, %v354_v14  ;;  %v372_v22 = vadd.f32 1e-05, %v370_v19  ;;  %v363_v23 = vmul.f32 0.125, %v342_v20  ;;  %v534_v14 = vld [vmem:[%s1161_s4 + $0x40] sm:$0xff]  ;;  %v533_v17 = vld [vmem:[%s1161_s4 + $0x38] sm:$0xff]  ;;  %v532_v20 = vld [vmem:[%s1161_s4 + $0x30] sm:$0xff] }
 0x15b   :  { %v365_v47 = vmul.f32 0.125, %v356_v21  ;;  %671 = vrsqrt.f32 %v372_v22  ;;  %v367_v25 = vmul.f32 %v363_v23, %v363_v23  ;;  %vm389_vm8 = vweird.f32 %v372_v22 }
 0x15d   :  { %v369_v27 = vsub.f32 %v365_v47, %v367_v25  ;;  %v529_v25 = vld [vmem:[%s1161_s4 + $0x18] sm:$0xff] }
 0x15f   :  { %v371_v28 = vadd.f32 1e-05, %v369_v27 }
 0x161   :  { %v672_v29 = vpop.eup %671  ;;  %673 = vrsqrt.f32 %v371_v28  ;;  %vm379_vm11 = vweird.f32 %v371_v28 }
 0x162   :  { %v384_v30 = vmul.f32 %v672_v29, %v372_v22  ;;  %vm390_vm7 = vweird.f32 %v672_v29 }
 0x163   :  { %vm391_vm9 = vmor %vm389_vm8, %vm390_vm7 }
 0x164   :  { %v385_v32 = vmul.f32 %v672_v29, %v384_v30 }
 0x166   :  { %v386_v33 = vmul.f32 0.5, %v385_v32  ;;  %v527_v32 = vld [vmem:[%s1161_s4 + $0x8] sm:$0xff] }
 0x167   :  { %v674_v34 = vpop.eup %673 }
 0x168   :  { %v387_v35 = vsub.f32 1.5, %v386_v33  ;;  %v374_v36 = vmul.f32 %v674_v34, %v371_v28  ;;  %vm380_vm10 = vweird.f32 %v674_v34  ;;  %v528_v28 = vld [vmem:[%s1161_s4 + $0x10] sm:$0xff] }
 0x169   :  { %vm381_vm12 = vmor %vm379_vm11, %vm380_vm10 }
 0x16a   :  { %v388_v37 = vmul.f32 %v672_v29, %v387_v35  ;;  %v375_v38 = vmul.f32 %v674_v34, %v374_v36 }
 0x16c   :  { %v392_v39 = vsel %vm391_vm9, %v672_v29, %v388_v37  ;;  %v376_v40 = vmul.f32 0.5, %v375_v38 }
 0x16d   :  { %v394_v41 = vmul.f32 %v392_v39, %v1025_v61 }
 0x16e   :  { %v377_v42 = vsub.f32 1.5, %v376_v40 }
 0x16f   :  { %v396_v43 = vmul.f32 %v394_v41, %v364_v11  ;;  %v406_v49 = vperm.slane %v394_v41, 2  ;;  %v535_v11 = vld [vmem:[%s1161_s4 + $0x48] sm:$0xff] }
 0x170   :  { %v378_v44 = vmul.f32 %v674_v34, %v377_v42 }
 0x171   :  { %v400_v45 = vrot.slane %v396_v43, 7  ;;  %v408_v53 = vmul.f32 %v406_v49, %v1033_v31  ;;  %v540_v31 = vld [vmem:[%s1161_s4 + $0x70] sm:$0xff] }
 0x172   :  { %v382_v50 = vsel %vm381_vm12, %v674_v34, %v378_v44  ;;  %v526_v34 = vld [vmem:[%s1161_s4] sm:$0xff] }
 0x173   :  { %v404_v51 = vsub.f32 %v1025_v61, %v400_v45  ;;  %v393_v52 = vmul.f32 %v382_v50, %v1020_v59  ;;  %v541_v61 = vld [vmem:[%s1161_s4 + $0x78] sm:$0xff] }
 0x174   :  { %542 = vmatpush.msra.mxu0 %v541_v61 }
 0x175   :  { %v410_v54 = vperm.slane %v404_v51, 3  ;;  %v395_v55 = vmul.f32 %v393_v52, %v363_v23  ;;  %v405_v58 = vperm.slane %v393_v52, 2  ;;  %v531_v23 = vld [vmem:[%s1161_s4 + $0x28] sm:$0xff] }
 0x176   :  { %543 = vmatpush.msra.mxu0 %v540_v31 }
 0x177   :  { %v412_v56 = vadd.f32 %v410_v54, %v408_v53  ;;  %v399_v57 = vrot.slane %v395_v55, 7  ;;  %v407_v63 = vmul.f32 %v405_v58, %v1039_v46  ;;  %v538_v46 = vld [vmem:[%s1161_s4 + $0x60] sm:$0xff]  ;;  %v616_v55 = vld [vmem:[%s1162_s5 + $0x78] sm:$0xff] }
 0x178   :  { %544 = vmatpush.msra.mxu0 %v539_v3  ;;  %618 = vmatpush.msra.mxu1 %v616_v55  ;;  %v613_v58 = vld [vmem:[%s1162_s5 + $0x60] sm:$0xff] }
 0x179   :  { %v414_v60 = vmax.f32 %v412_v56, 0.0  ;;  %v403_v62 = vsub.f32 %v1020_v59, %v399_v57  ;;  %v615_v56 = vld [vmem:[%s1162_s5 + $0x70] sm:$0xff]  ;;  %v614_v57 = vld [vmem:[%s1162_s5 + $0x68] sm:$0xff]  ;;  %v609_v3 = vld [vmem:[%s1162_s5 + $0x40] sm:$0xff] }
 0x17a   :  { %545 = vmatpush.msra.mxu0 %v538_v46  ;;  %619 = vmatpush.msra.mxu1 %v615_v56 }
 0x17b   :  { %483 = vmatmul.f32.vlgmr.msrb.gmra.mxu3 %v414_v60  ;;  %v409_v0 = vperm.slane %v403_v62, 3  ;;  %v612_v60 = vld [vmem:[%s1162_s5 + $0x58] sm:$0xff]  ;;  %v611_v62 = vld [vmem:[%s1162_s5 + $0x50] sm:$0xff] }
 0x17c   :  { %546 = vmatpush.msra.mxu0 %v537_v4  ;;  %620 = vmatpush.msra.mxu1 %v614_v57 }
 0x17d   :  { %v411_v1 = vadd.f32 %v409_v0, %v407_v63 }
 0x17e   :  { %547 = vmatpush.msra.mxu0 %v536_v8  ;;  %621 = vmatpush.msra.mxu1 %v613_v58  ;;  %v607_v8 = vld [vmem:[%s1162_s5 + $0x30] sm:$0xff] }
 0x17f   :  { %v413_v2 = vmax.f32 %v411_v1, 0.0 }
 0x180   :  { %548 = vmatpush.msra.mxu0 %v535_v11  ;;  %622 = vmatpush.msra.mxu1 %v612_v60  ;;  %v606_v11 = vld [vmem:[%s1162_s5 + $0x28] sm:$0xff] }
 0x181   :  { %463 = vmatmul.f32.vlgmr.msrb.gmra.mxu2 %v413_v2  ;;  %v610_v2 = vld [vmem:[%s1162_s5 + $0x48] sm:$0xff] }
 0x182   :  { %549 = vmatpush.msra.mxu0 %v534_v14  ;;  %623 = vmatpush.msra.mxu1 %v611_v62  ;;  %v605_v14 = vld [vmem:[%s1162_s5 + $0x20] sm:$0xff] }
 0x184   :  { %550 = vmatpush.msra.mxu0 %v533_v17  ;;  %624 = vmatpush.msra.mxu1 %v610_v2  ;;  %v604_v17 = vld [vmem:[%s1162_s5 + $0x18] sm:$0xff] }
 0x186   :  { %551 = vmatpush.msra.mxu0 %v532_v20  ;;  %625 = vmatpush.msra.mxu1 %v609_v3  ;;  %v603_v20 = vld [vmem:[%s1162_s5 + $0x10] sm:$0xff] }
 0x188   :  { %552 = vmatpush.msra.mxu0 %v531_v23 }
 0x18a   :  { %553 = vmatpush.msra.mxu0 %v530_v48 }
 0x18c   :  { %554 = vmatpush.msra.mxu0 %v529_v25 }
 0x18e   :  { %555 = vmatpush.msra.mxu0 %v528_v28 }
 0x190   :  { %556 = vmatpush.msra.mxu0 %v527_v32 }
 0x192   :  { %557 = vmatpush.msra.mxu0 %v526_v34 }
 0x1fe   :  { %v484_v5 = vpop.f32.mrf.mxu3 }
 0x204   :  { %v464_v6 = vpop.f32.mrf.mxu2 }
 0x205   :  { %v485_v7 = vadd.f32 %v484_v5, %v464_v6  ;;  %v608_v5 = vld [vmem:[%s1162_s5 + $0x38] sm:$0xff] }
 0x206   :  { %626 = vmatpush.msra.mxu1 %v608_v5 }
 0x207   :  { %v487_v9 = vrot.slane %v485_v7, 4  ;;  %v493_v10 = vmul.f32 %v485_v7, %v485_v7 }
 0x208   :  { %627 = vmatpush.msra.mxu1 %v607_v8 }
 0x209   :  { %v488_v12 = vadd.f32 %v487_v9, %v485_v7  ;;  %v494_v13 = vrot.slane %v493_v10, 4 }
 0x20a   :  { %628 = vmatpush.msra.mxu1 %v606_v11 }
 0x20b   :  { %v489_v15 = vrot.slane %v488_v12, 2  ;;  %v495_v16 = vadd.f32 %v494_v13, %v493_v10 }
 0x20c   :  { %629 = vmatpush.msra.mxu1 %v605_v14 }
 0x20d   :  { %v490_v18 = vadd.f32 %v489_v15, %v488_v12  ;;  %v496_v19 = vrot.slane %v495_v16, 2 }
 0x20e   :  { %630 = vmatpush.msra.mxu1 %v604_v17 }
 0x20f   :  { %v491_v21 = vrot.slane %v490_v18, 1  ;;  %v497_v22 = vadd.f32 %v496_v19, %v495_v16 }
 0x210   :  { %631 = vmatpush.msra.mxu1 %v603_v20 }
 0x211   :  { %v492_v47 = vadd.f32 %v491_v21, %v490_v18  ;;  %v498_v24 = vrot.slane %v497_v22, 1 }
 0x213   :  { %v499_v26 = vadd.f32 %v498_v24, %v497_v22  ;;  %v500_v27 = vmul.f32 0.125, %v492_v47  ;;  %v602_v22 = vld [vmem:[%s1162_s5 + $0x8] sm:$0xff]  ;;  %v601_v47 = vld [vmem:[%s1162_s5] sm:$0xff] }
 0x214   :  { %632 = vmatpush.msra.mxu1 %v602_v22 }
 0x215   :  { %v501_v29 = vmul.f32 0.125, %v499_v26  ;;  %v502_v30 = vmul.f32 %v500_v27, %v500_v27 }
 0x216   :  { %633 = vmatpush.msra.mxu1 %v601_v47 }
 0x217   :  { %v503_v33 = vsub.f32 %v501_v29, %v502_v30 }
 0x219   :  { %v504_v35 = vadd.f32 1e-05, %v503_v33 }
 0x21b   :  { %675 = vrsqrt.f32 %v504_v35  ;;  %vm511_vm14 = vweird.f32 %v504_v35 }
 0x221   :  { %v676_v36 = vpop.eup %675 }
 0x222   :  { %v506_v37 = vmul.f32 %v676_v36, %v504_v35  ;;  %vm512_vm13 = vweird.f32 %v676_v36 }
 0x223   :  { %vm513_vm15 = vmor %vm511_vm14, %vm512_vm13 }
 0x224   :  { %v507_v38 = vmul.f32 %v676_v36, %v506_v37 }
 0x226   :  { %v508_v39 = vmul.f32 0.5, %v507_v38 }
 0x228   :  { %v509_v40 = vsub.f32 1.5, %v508_v39 }
 0x22a   :  { %v510_v41 = vmul.f32 %v676_v36, %v509_v40  ;;  %v666_v40 = vld [vmem:[%s1163_s6 + $0x10] ss:$0 sm:$0xff] }
 0x22c   :  { %v514_v42 = vsel %vm513_vm15, %v676_v36, %v510_v41 }
 0x22d   :  { %v515_v43 = vmul.f32 %v514_v42, %v1020_v59 }
 0x22f   :  { %v516_v44 = vmul.f32 %v515_v43, %v500_v27  ;;  %v521_v45 = vperm.slane %v515_v43, 4 }
 0x231   :  { %v518_v49 = vrot.slane %v516_v44, 7  ;;  %v522_v51 = vmul.f32 %v521_v45, %v485_v7 }
 0x233   :  { %v520_v50 = vsub.f32 %v1020_v59, %v518_v49 }
 0x235   :  { %v523_v52 = vperm.slane %v520_v50, 5 }
 0x237   :  { %v524_v53 = vadd.f32 %v523_v52, %v522_v51 }
 0x239   :  { %v525_v54 = vmax.f32 %v524_v53, 0.0 }
 0x23b   :  { %558 = vmatmul.f32.vlgmr.msra.gmra.mxu0 %v525_v54 }
 0x2b8   :  { %v559_v63 = vpop.f32.mrf.mxu0 }
 0x2b9   :  { %v562_v0 = vrot.slane %v559_v63, 4  ;;  %v568_v1 = vmul.f32 %v559_v63, %v559_v63 }
 0x2bb   :  { %v563_v61 = vadd.f32 %v562_v0, %v559_v63  ;;  %v569_v31 = vrot.slane %v568_v1, 4 }
 0x2bd   :  { %v564_v46 = vrot.slane %v563_v61, 2  ;;  %v570_v4 = vadd.f32 %v569_v31, %v568_v1 }
 0x2bf   :  { %v565_v6 = vadd.f32 %v564_v46, %v563_v61  ;;  %v571_v7 = vrot.slane %v570_v4, 2 }
 0x2c1   :  { %v566_v9 = vrot.slane %v565_v6, 1  ;;  %v572_v10 = vadd.f32 %v571_v7, %v570_v4 }
 0x2c3   :  { %v567_v12 = vadd.f32 %v566_v9, %v565_v6  ;;  %v573_v13 = vrot.slane %v572_v10, 1 }
 0x2c5   :  { %v574_v15 = vadd.f32 %v573_v13, %v572_v10  ;;  %v575_v16 = vmul.f32 0.125, %v567_v12 }
 0x2c7   :  { %v576_v18 = vmul.f32 0.125, %v574_v15  ;;  %v577_v19 = vmul.f32 %v575_v16, %v575_v16 }
 0x2c9   :  { %v578_v21 = vsub.f32 %v576_v18, %v577_v19 }
 0x2cb   :  { %v579_v23 = vadd.f32 1e-05, %v578_v21 }
 0x2cd   :  { %677 = vrsqrt.f32 %v579_v23  ;;  %vm586_vm1 = vweird.f32 %v579_v23 }
 0x2d3   :  { %v678_v24 = vpop.eup %677 }
 0x2d4   :  { %v581_v48 = vmul.f32 %v678_v24, %v579_v23  ;;  %vm587_vm0 = vweird.f32 %v678_v24 }
 0x2d5   :  { %vm588_vm2 = vmor %vm586_vm1, %vm587_vm0 }
 0x2d6   :  { %v582_v25 = vmul.f32 %v678_v24, %v581_v48 }
 0x2d8   :  { %v583_v26 = vmul.f32 0.5, %v582_v25 }
 0x2da   :  { %v584_v27 = vsub.f32 1.5, %v583_v26 }
 0x2dc   :  { %v585_v28 = vmul.f32 %v678_v24, %v584_v27 }
 0x2de   :  { %v589_v29 = vsel %vm588_vm2, %v678_v24, %v585_v28 }
 0x2df   :  { %v590_v30 = vmul.f32 %v589_v29, %v1020_v59 }
 0x2e1   :  { %v591_v32 = vmul.f32 %v590_v30, %v575_v16  ;;  %v596_v34 = vperm.slane %v590_v30, 6 }
 0x2e3   :  { %v593_v33 = vrot.slane %v591_v32, 7  ;;  %v597_v36 = vmul.f32 %v596_v34, %v559_v63 }
 0x2e5   :  { %v595_v35 = vsub.f32 %v1020_v59, %v593_v33 }
 0x2e7   :  { %v598_v37 = vperm.slane %v595_v35, 7 }
 0x2e9   :  { %v599_v38 = vadd.f32 %v598_v37, %v597_v36 }
 0x2eb   :  { %v600_v39 = vmax.f32 %v599_v38, 0.0 }
 0x2ed   :  { %634 = vmatmul.f32.vlgmr.msra.gmra.mxu1 %v600_v39 }
 0x36a   :  { %v635_v41 = vpop.f32.mrf.mxu1 }
 0x36b   :  { %v636_v42 = vadd.f32 %v666_v40, %v635_v41 }
 0x36d   :  { %638 = vst [vmem:[#allocation7] sm:$0xff] %v636_v42 }
 0x36e   :  { %649 = dma.vmem_to_hbm [thread:$0]  %s645_s25, 128, %s647_s28, [#allocation4]  }
 0x36f   :  { %755 = dma.done.wait [#allocation4], 128  }
 0x370   :  { %756 = vsyncadd [#allocation4], 4294967168 }
 0x371   :  { %654 = vsyncpa [#allocation3], 1 }
 0x372   :  { %655 = vsyncpa [#allocation6], 1 }
 0x373   :  { %656 = vsyncpa [#allocation4], 1 }

</bundles_post_ra>
